<compile_context>
chip_gen: v7x
topology: tpu7x:2x2x1
jax: 0.10.0
libtpu: 0.0.40
codegen_flags: <defaults>
</compile_context>

<pallas_src>
import jax
import jax.numpy as jnp
from jax.experimental import pallas as pl
from jax.experimental.pallas import tpu as pltpu


def _deepnn_kernel(x_ref,
                   w1_ref, b1_ref,
                   w2_ref, b2_ref,
                   w3_ref, b3_ref,
                   w4_ref, b4_ref,
                   w5_ref, b5_ref,
                   w6_ref, b6_ref,
                   o_ref):
    """Fused (Linear -> ReLU) x5 -> Linear for one (TB, D_in_pad) batch tile."""

    def dense(h, w_ref, b_ref, relu):
        # bf16 operands on the MXU, fp32 accumulation; bias/ReLU in fp32.
        y = jnp.dot(h.astype(jnp.bfloat16), w_ref[...],
                    preferred_element_type=jnp.float32)
        y = y + b_ref[...]              # (1, D_out) fp32 bias broadcasts over rows
        if relu:
            y = jnp.maximum(y, 0.0)
        return y

    h = x_ref[...]                      # (TB, D_in_pad) bf16 batch tile
    h = dense(h, w1_ref, b1_ref, relu=True)
    h = dense(h, w2_ref, b2_ref, relu=True)
    h = dense(h, w3_ref, b3_ref, relu=True)
    h = dense(h, w4_ref, b4_ref, relu=True)
    h = dense(h, w5_ref, b5_ref, relu=True)
    h = dense(h, w6_ref, b6_ref, relu=False)   # output head: raw logits (lane-dense 128)
    o_ref[...] = h.astype(o_ref.dtype)


def _round_up(x, m):
    return ((x + m - 1) // m) * m


def deepnn_forward(x, params, *, tb_max=256):
    """params = [(W1, b1), ..., (W6, b6)], W: (D_in, D_out), b: (1, D_out)."""
    batch, in_dim = x.shape
    out_dim = params[-1][0].shape[1]
    out_pad = _round_up(out_dim, 128)        # lane-dense output slab
    in_pad = _round_up(in_dim, 128)          # lane-dense input slab
    n_layers = len(params)

    # Kernel operands: bf16 weights (cast once here), fp32 biases.
    #   - layer 0 weight: rows zero-padded to the lane-dense input width
    #   - last layer: cols zero-padded to the lane-dense output width
    flat = []
    for li, (w, b) in enumerate(params):
        if li == 0 and in_pad != in_dim:
            w = jnp.pad(w, ((0, in_pad - in_dim), (0, 0)))
        if li == n_layers - 1 and out_pad != out_dim:
            w = jnp.pad(w, ((0, 0), (0, out_pad - out_dim)))
            b = jnp.pad(b, ((0, 0), (0, out_pad - out_dim)))
        flat.append(w.astype(jnp.bfloat16))
        flat.append(b.astype(jnp.float32))

    # Adaptive batch tile: small batches are only padded up to 8 sublanes,
    # large batches stream in 256-row tiles.
    tb = min(tb_max, _round_up(max(batch, 1), 8))
    b_padded = _round_up(max(batch, 1), tb)

    # Pad batch / feature dims; activations travel as bf16.
    x_p = x.astype(jnp.bfloat16)
    x_p = jnp.pad(x_p, ((0, b_padded - batch), (0, in_pad - in_dim)))

    vmem = pltpu.MemorySpace.VMEM
    # Whole-array, VMEM-resident (single copy, not re-DMA'd per batch tile).
    resident = pl.BlockSpec(memory_space=vmem)

    flops = 2 * b_padded * sum(w.shape[0] * w.shape[1] for w, _ in params)
    bytes_accessed = (x_p.size * x_p.dtype.itemsize
                      + sum(a.size * a.dtype.itemsize for a in flat)
                      + b_padded * out_pad * 4)

    out = pl.pallas_call(
        _deepnn_kernel,
        out_shape=jax.ShapeDtypeStruct((b_padded, out_pad), jnp.float32),
        grid=(b_padded // tb,),
        in_specs=[pl.BlockSpec((tb, in_pad), lambda i: (i, 0))]
                 + [resident] * len(flat),
        out_specs=pl.BlockSpec((tb, out_pad), lambda i: (i, 0)),
        compiler_params=pltpu.CompilerParams(
            dimension_semantics=("parallel",),
            vmem_limit_bytes=32 * 1024 * 1024,
        ),
        cost_estimate=pl.CostEstimate(
            flops=flops, transcendentals=0, bytes_accessed=bytes_accessed),
    )(x_p, *flat)

    return out[:batch, :out_dim]


def init_params(key, dims):
    """Deterministic Kaiming-ish init for the MLP layer stack (fp32 master copy)."""
    params = []
    for i, (d_in, d_out) in enumerate(zip(dims[:-1], dims[1:])):
        kw, kb, key = jax.random.split(jax.random.fold_in(key, i), 3)
        scale = jnp.sqrt(2.0 / d_in).astype(jnp.float32)
        w = jax.random.normal(kw, (d_in, d_out), dtype=jnp.float32) * scale
        b = 0.01 * jax.random.normal(kb, (1, d_out), dtype=jnp.float32)
        params.append((w, b))
    return params


def reference_forward(x, params):
    """Pure-JAX reference mirroring the kernel's bf16-matmul / fp32-accumulate math."""
    h = x.astype(jnp.bfloat16)
    n = len(params)
    for i, (w, b) in enumerate(params):
        h = jnp.dot(h.astype(jnp.bfloat16), w.astype(jnp.bfloat16),
                    preferred_element_type=jnp.float32) + b
        if i < n - 1:
            h = jnp.maximum(h, 0.0)
    return h


if __name__ == "__main__":
    key = jax.random.PRNGKey(0)

    batch, in_dim, hidden, out_dim = 8, 32, 128, 10
    dims = [in_dim] + [hidden] * 5 + [out_dim]   # 5 hidden layers

    kx, kp = jax.random.split(key)
    x = jax.random.normal(kx, (batch, in_dim), dtype=jnp.float32)
    params = init_params(kp, dims)

    out = deepnn_forward(x, params)
    out = jax.block_until_ready(out)

    ref = reference_forward(x, params)
    assert out.shape == (batch, out_dim)
    assert jnp.allclose(out, ref, atol=1e-2, rtol=1e-2), "mismatch vs reference"

    print("KERNEL_OK")
</pallas_src>

<mosaic_0001>
module attributes {stable_mosaic.version = 11 : i64} {
  func.func @_deepnn_kernel(%arg0: i32, %arg1: memref<8x128xbf16, #tpu.memory_space<vmem>>, %arg2: memref<128x128xbf16, #tpu.memory_space<vmem>>, %arg3: memref<1x128xf32, #tpu.memory_space<vmem>>, %arg4: memref<128x128xbf16, #tpu.memory_space<vmem>>, %arg5: memref<1x128xf32, #tpu.memory_space<vmem>>, %arg6: memref<128x128xbf16, #tpu.memory_space<vmem>>, %arg7: memref<1x128xf32, #tpu.memory_space<vmem>>, %arg8: memref<128x128xbf16, #tpu.memory_space<vmem>>, %arg9: memref<1x128xf32, #tpu.memory_space<vmem>>, %arg10: memref<128x128xbf16, #tpu.memory_space<vmem>>, %arg11: memref<1x128xf32, #tpu.memory_space<vmem>>, %arg12: memref<128x128xbf16, #tpu.memory_space<vmem>>, %arg13: memref<1x128xf32, #tpu.memory_space<vmem>>, %arg14: memref<8x128xf32, #tpu.memory_space<vmem>>) attributes {dimension_semantics = [#tpu.dimension_semantics<parallel>], iteration_bounds = array<i64: 1>, scalar_prefetch = 0 : i64, scratch_operands = 0 : i64, tpu.core_type = #tpu.core_type<tc>, window_params = [{transform_indices = @transform_0, window_bounds = array<i64: 8, 128>}, {pipeline_mode = #tpu.pipeline_mode<synchronous>, transform_indices = @transform_1, window_bounds = array<i64: 128, 128>}, {pipeline_mode = #tpu.pipeline_mode<synchronous>, transform_indices = @transform_2, window_bounds = array<i64: 1, 128>}, {pipeline_mode = #tpu.pipeline_mode<synchronous>, transform_indices = @transform_3, window_bounds = array<i64: 128, 128>}, {pipeline_mode = #tpu.pipeline_mode<synchronous>, transform_indices = @transform_4, window_bounds = array<i64: 1, 128>}, {pipeline_mode = #tpu.pipeline_mode<synchronous>, transform_indices = @transform_5, window_bounds = array<i64: 128, 128>}, {pipeline_mode = #tpu.pipeline_mode<synchronous>, transform_indices = @transform_6, window_bounds = array<i64: 1, 128>}, {pipeline_mode = #tpu.pipeline_mode<synchronous>, transform_indices = @transform_7, window_bounds = array<i64: 128, 128>}, {pipeline_mode = #tpu.pipeline_mode<synchronous>, transform_indices = @transform_8, window_bounds = array<i64: 1, 128>}, {pipeline_mode = #tpu.pipeline_mode<synchronous>, transform_indices = @transform_9, window_bounds = array<i64: 128, 128>}, {pipeline_mode = #tpu.pipeline_mode<synchronous>, transform_indices = @transform_10, window_bounds = array<i64: 1, 128>}, {pipeline_mode = #tpu.pipeline_mode<synchronous>, transform_indices = @transform_11, window_bounds = array<i64: 128, 128>}, {pipeline_mode = #tpu.pipeline_mode<synchronous>, transform_indices = @transform_12, window_bounds = array<i64: 1, 128>}, {transform_indices = @transform_13, window_bounds = array<i64: 8, 128>}]} {
    %c0 = arith.constant 0 : index
    %c0_0 = arith.constant 0 : index
    %0 = vector.load %arg1[%c0, %c0_0] : memref<8x128xbf16, #tpu.memory_space<vmem>>, vector<8x128xbf16>
    %c0_1 = arith.constant 0 : index
    %c0_2 = arith.constant 0 : index
    %1 = vector.load %arg2[%c0_1, %c0_2] : memref<128x128xbf16, #tpu.memory_space<vmem>>, vector<128x128xbf16>
    %cst = arith.constant dense<0.000000e+00> : vector<8x128xf32>
    %2 = tpu.matmul %0, %1, %cst {dimension_numbers = #tpu.dot_dimension_numbers<[1], [0], [0], [1], [0, 0, 1, 1], [], []>} : vector<8x128xbf16>, vector<128x128xbf16>, vector<8x128xf32> -> vector<8x128xf32>
    %c0_3 = arith.constant 0 : index
    %c0_4 = arith.constant 0 : index
    %3 = vector.load %arg3[%c0_3, %c0_4] : memref<1x128xf32, #tpu.memory_space<vmem>>, vector<1x128xf32>
    %4 = vector.broadcast %3 : vector<1x128xf32> to vector<8x128xf32>
    %5 = arith.addf %2, %4 : vector<8x128xf32>
    %cst_5 = arith.constant 0.000000e+00 : f32
    %6 = vector.broadcast %cst_5 : f32 to vector<8x128xf32>
    %7 = arith.maximumf %5, %6 : vector<8x128xf32>
    %8 = arith.truncf %7 : vector<8x128xf32> to vector<8x128xbf16>
    %c0_6 = arith.constant 0 : index
    %c0_7 = arith.constant 0 : index
    %9 = vector.load %arg4[%c0_6, %c0_7] : memref<128x128xbf16, #tpu.memory_space<vmem>>, vector<128x128xbf16>
    %cst_8 = arith.constant dense<0.000000e+00> : vector<8x128xf32>
    %10 = tpu.matmul %8, %9, %cst_8 {dimension_numbers = #tpu.dot_dimension_numbers<[1], [0], [0], [1], [0, 0, 1, 1], [], []>} : vector<8x128xbf16>, vector<128x128xbf16>, vector<8x128xf32> -> vector<8x128xf32>
    %c0_9 = arith.constant 0 : index
    %c0_10 = arith.constant 0 : index
    %11 = vector.load %arg5[%c0_9, %c0_10] : memref<1x128xf32, #tpu.memory_space<vmem>>, vector<1x128xf32>
    %12 = vector.broadcast %11 : vector<1x128xf32> to vector<8x128xf32>
    %13 = arith.addf %10, %12 : vector<8x128xf32>
    %cst_11 = arith.constant 0.000000e+00 : f32
    %14 = vector.broadcast %cst_11 : f32 to vector<8x128xf32>
    %15 = arith.maximumf %13, %14 : vector<8x128xf32>
    %16 = arith.truncf %15 : vector<8x128xf32> to vector<8x128xbf16>
    %c0_12 = arith.constant 0 : index
    %c0_13 = arith.constant 0 : index
    %17 = vector.load %arg6[%c0_12, %c0_13] : memref<128x128xbf16, #tpu.memory_space<vmem>>, vector<128x128xbf16>
    %cst_14 = arith.constant dense<0.000000e+00> : vector<8x128xf32>
    %18 = tpu.matmul %16, %17, %cst_14 {dimension_numbers = #tpu.dot_dimension_numbers<[1], [0], [0], [1], [0, 0, 1, 1], [], []>} : vector<8x128xbf16>, vector<128x128xbf16>, vector<8x128xf32> -> vector<8x128xf32>
    %c0_15 = arith.constant 0 : index
    %c0_16 = arith.constant 0 : index
    %19 = vector.load %arg7[%c0_15, %c0_16] : memref<1x128xf32, #tpu.memory_space<vmem>>, vector<1x128xf32>
    %20 = vector.broadcast %19 : vector<1x128xf32> to vector<8x128xf32>
    %21 = arith.addf %18, %20 : vector<8x128xf32>
    %cst_17 = arith.constant 0.000000e+00 : f32
    %22 = vector.broadcast %cst_17 : f32 to vector<8x128xf32>
    %23 = arith.maximumf %21, %22 : vector<8x128xf32>
    %24 = arith.truncf %23 : vector<8x128xf32> to vector<8x128xbf16>
    %c0_18 = arith.constant 0 : index
    %c0_19 = arith.constant 0 : index
    %25 = vector.load %arg8[%c0_18, %c0_19] : memref<128x128xbf16, #tpu.memory_space<vmem>>, vector<128x128xbf16>
    %cst_20 = arith.constant dense<0.000000e+00> : vector<8x128xf32>
    %26 = tpu.matmul %24, %25, %cst_20 {dimension_numbers = #tpu.dot_dimension_numbers<[1], [0], [0], [1], [0, 0, 1, 1], [], []>} : vector<8x128xbf16>, vector<128x128xbf16>, vector<8x128xf32> -> vector<8x128xf32>
    %c0_21 = arith.constant 0 : index
    %c0_22 = arith.constant 0 : index
    %27 = vector.load %arg9[%c0_21, %c0_22] : memref<1x128xf32, #tpu.memory_space<vmem>>, vector<1x128xf32>
    %28 = vector.broadcast %27 : vector<1x128xf32> to vector<8x128xf32>
    %29 = arith.addf %26, %28 : vector<8x128xf32>
    %cst_23 = arith.constant 0.000000e+00 : f32
    %30 = vector.broadcast %cst_23 : f32 to vector<8x128xf32>
    %31 = arith.maximumf %29, %30 : vector<8x128xf32>
    %32 = arith.truncf %31 : vector<8x128xf32> to vector<8x128xbf16>
    %c0_24 = arith.constant 0 : index
    %c0_25 = arith.constant 0 : index
    %33 = vector.load %arg10[%c0_24, %c0_25] : memref<128x128xbf16, #tpu.memory_space<vmem>>, vector<128x128xbf16>
    %cst_26 = arith.constant dense<0.000000e+00> : vector<8x128xf32>
    %34 = tpu.matmul %32, %33, %cst_26 {dimension_numbers = #tpu.dot_dimension_numbers<[1], [0], [0], [1], [0, 0, 1, 1], [], []>} : vector<8x128xbf16>, vector<128x128xbf16>, vector<8x128xf32> -> vector<8x128xf32>
    %c0_27 = arith.constant 0 : index
    %c0_28 = arith.constant 0 : index
    %35 = vector.load %arg11[%c0_27, %c0_28] : memref<1x128xf32, #tpu.memory_space<vmem>>, vector<1x128xf32>
    %36 = vector.broadcast %35 : vector<1x128xf32> to vector<8x128xf32>
    %37 = arith.addf %34, %36 : vector<8x128xf32>
    %cst_29 = arith.constant 0.000000e+00 : f32
    %38 = vector.broadcast %cst_29 : f32 to vector<8x128xf32>
    %39 = arith.maximumf %37, %38 : vector<8x128xf32>
    %40 = arith.truncf %39 : vector<8x128xf32> to vector<8x128xbf16>
    %c0_30 = arith.constant 0 : index
    %c0_31 = arith.constant 0 : index
    %41 = vector.load %arg12[%c0_30, %c0_31] : memref<128x128xbf16, #tpu.memory_space<vmem>>, vector<128x128xbf16>
    %cst_32 = arith.constant dense<0.000000e+00> : vector<8x128xf32>
    %42 = tpu.matmul %40, %41, %cst_32 {dimension_numbers = #tpu.dot_dimension_numbers<[1], [0], [0], [1], [0, 0, 1, 1], [], []>} : vector<8x128xbf16>, vector<128x128xbf16>, vector<8x128xf32> -> vector<8x128xf32>
    %c0_33 = arith.constant 0 : index
    %c0_34 = arith.constant 0 : index
    %43 = vector.load %arg13[%c0_33, %c0_34] : memref<1x128xf32, #tpu.memory_space<vmem>>, vector<1x128xf32>
    %44 = vector.broadcast %43 : vector<1x128xf32> to vector<8x128xf32>
    %45 = arith.addf %42, %44 : vector<8x128xf32>
    %c0_35 = arith.constant 0 : index
    %c0_36 = arith.constant 0 : index
    %46 = vector.load %arg14[%c0_35, %c0_36] : memref<8x128xf32, #tpu.memory_space<vmem>>, vector<8x128xf32>
    tpu.vector_store %arg14[%c0_35, %c0_36], %45 {strides = array<i32>} : memref<8x128xf32, #tpu.memory_space<vmem>>, vector<8x128xf32>,
    return
  }
  func.func @transform_0(%arg0: i32) -> (i32, i32) {
    %c0_i32 = arith.constant 0 : i32
    %c0_i32_0 = arith.constant 0 : i32
    return %arg0, %c0_i32 : i32, i32
  }
  func.func @transform_1(%arg0: i32) -> (i32, i32) {
    %c0_i32 = arith.constant 0 : i32
    %c0_i32_0 = arith.constant 0 : i32
    %c0_i32_1 = arith.constant 0 : i32
    return %c0_i32, %c0_i32_0 : i32, i32
  }
  func.func @transform_2(%arg0: i32) -> (i32, i32) {
    %c0_i32 = arith.constant 0 : i32
    %c0_i32_0 = arith.constant 0 : i32
    %c0_i32_1 = arith.constant 0 : i32
    return %c0_i32, %c0_i32_0 : i32, i32
  }
  func.func @transform_3(%arg0: i32) -> (i32, i32) {
    %c0_i32 = arith.constant 0 : i32
    %c0_i32_0 = arith.constant 0 : i32
    %c0_i32_1 = arith.constant 0 : i32
    return %c0_i32, %c0_i32_0 : i32, i32
  }
  func.func @transform_4(%arg0: i32) -> (i32, i32) {
    %c0_i32 = arith.constant 0 : i32
    %c0_i32_0 = arith.constant 0 : i32
    %c0_i32_1 = arith.constant 0 : i32
    return %c0_i32, %c0_i32_0 : i32, i32
  }
  func.func @transform_5(%arg0: i32) -> (i32, i32) {
    %c0_i32 = arith.constant 0 : i32
    %c0_i32_0 = arith.constant 0 : i32
    %c0_i32_1 = arith.constant 0 : i32
    return %c0_i32, %c0_i32_0 : i32, i32
  }
  func.func @transform_6(%arg0: i32) -> (i32, i32) {
    %c0_i32 = arith.constant 0 : i32
    %c0_i32_0 = arith.constant 0 : i32
    %c0_i32_1 = arith.constant 0 : i32
    return %c0_i32, %c0_i32_0 : i32, i32
  }
  func.func @transform_7(%arg0: i32) -> (i32, i32) {
    %c0_i32 = arith.constant 0 : i32
    %c0_i32_0 = arith.constant 0 : i32
    %c0_i32_1 = arith.constant 0 : i32
    return %c0_i32, %c0_i32_0 : i32, i32
  }
  func.func @transform_8(%arg0: i32) -> (i32, i32) {
    %c0_i32 = arith.constant 0 : i32
    %c0_i32_0 = arith.constant 0 : i32
    %c0_i32_1 = arith.constant 0 : i32
    return %c0_i32, %c0_i32_0 : i32, i32
  }
  func.func @transform_9(%arg0: i32) -> (i32, i32) {
    %c0_i32 = arith.constant 0 : i32
    %c0_i32_0 = arith.constant 0 : i32
    %c0_i32_1 = arith.constant 0 : i32
    return %c0_i32, %c0_i32_0 : i32, i32
  }
  func.func @transform_10(%arg0: i32) -> (i32, i32) {
    %c0_i32 = arith.constant 0 : i32
    %c0_i32_0 = arith.constant 0 : i32
    %c0_i32_1 = arith.constant 0 : i32
    return %c0_i32, %c0_i32_0 : i32, i32
  }
  func.func @transform_11(%arg0: i32) -> (i32, i32) {
    %c0_i32 = arith.constant 0 : i32
    %c0_i32_0 = arith.constant 0 : i32
    %c0_i32_1 = arith.constant 0 : i32
    return %c0_i32, %c0_i32_0 : i32, i32
  }
  func.func @transform_12(%arg0: i32) -> (i32, i32) {
    %c0_i32 = arith.constant 0 : i32
    %c0_i32_0 = arith.constant 0 : i32
    %c0_i32_1 = arith.constant 0 : i32
    return %c0_i32, %c0_i32_0 : i32, i32
  }
  func.func @transform_13(%arg0: i32) -> (i32, i32) {
    %c0_i32 = arith.constant 0 : i32
    %c0_i32_0 = arith.constant 0 : i32
    return %arg0, %c0_i32 : i32, i32
  }
}

</mosaic_0001>

<bundles_post_ra>
// kernel: tpu_custom_call.1
= control target key start
LH: loop header
LB: loop body
LE: loop exit
PB: predicated region body
PF: predicated region fallthrough
CT: control target
= control target key end

     0   :  { %18 = vsyncpa [#allocation3], 0  ;;  %s1583_s0 = inlined_call_operand.hbm [shape: bf16[8,128], index: 0, kind: input, shape index: {}]   ;;  %s1584_s1 = inlined_call_operand.hbm [shape: bf16[128,128], index: 1, kind: input, shape index: {}]   ;;  %s1585_s2 = inlined_call_operand.vmem [shape: f32[1,128], index: 2, kind: input, shape index: {}]   ;;  %s1586_s3 = inlined_call_operand.hbm [shape: bf16[128,128], index: 3, kind: input, shape index: {}]   ;;  %s1587_s4 = inlined_call_operand.vmem [shape: f32[1,128], index: 4, kind: input, shape index: {}]   ;;  %s1588_s5 = inlined_call_operand.hbm [shape: bf16[128,128], index: 5, kind: input, shape index: {}]   ;;  %s1589_s6 = inlined_call_operand.vmem [shape: f32[1,128], index: 6, kind: input, shape index: {}]   ;;  %s1590_s7 = inlined_call_operand.hbm [shape: bf16[128,128], index: 7, kind: input, shape index: {}]   ;;  %s1591_s8 = inlined_call_operand.vmem [shape: f32[1,128], index: 8, kind: input, shape index: {}]   ;;  %s1592_s9 = inlined_call_operand.hbm [shape: bf16[128,128], index: 9, kind: input, shape index: {}]   ;;  %s1593_s10 = inlined_call_operand.vmem [shape: f32[1,128], index: 10, kind: input, shape index: {}]   ;;  %s1594_s11 = inlined_call_operand.hbm [shape: bf16[128,128], index: 11, kind: input, shape index: {}]   ;;  %s1595_s12 = inlined_call_operand.vmem [shape: f32[1,128], index: 12, kind: input, shape index: {}]   ;;  %s1596_s13 = inlined_call_operand.hbm [shape: f32[8,128], index: 13, kind: output, shape index: {}]  }
   0x1   :  { %19 = vsyncpa [#allocation6], 0 }
   0x2   :  { %20 = vsyncpa [#allocation9], 0 }
   0x3   :  { %21 = vsyncpa [#allocation12], 0 }
   0x4   :  { %22 = vsyncpa [#allocation4], 0  ;;  %s1309_s25 = smov [#allocation5]   ;;  %s1123_s29 = scalar_lea.hbm %s1584_s1, 1024 }
   0x5   :  { %s38_s26 = sshll.u32 %s1309_s25, 4  ;;  %p1124_p0 = scmp.ne.s32.totalorder %s1584_s1, %s1123_s29  ;;  %s39_s26 = int_to_ptr.vmem [resolvable:$true] %s38_s26 }
   0x6   :  { %p1127_p1 = scmp.lt.u32.totalorder %s1123_s29, %s1584_s1 }
   0x8   :  { %p1129_p2 = pnand %p1127_p1, %p1124_p0 }
   0xa   :  { %1132 = shalt.err (!%p1129_p2)
}
   0xb   :  { %s1133_s17 = scalar_lea.vmem %s39_s26, 1024  ;;  %p1138_p4 = scmp.lt.s32.totalorder %s39_s26, %s39_s26 }
   0xc   :  { %p1134_p3 = scmp.ne.s32.totalorder %s39_s26, %s1133_s17  ;;  %p1139_p5 = scmp.lt.s32.totalorder %s1133_s17, %s1133_s17 }
   0xe   :  { %p1140_p6 = por %p1139_p5, %p1138_p4 }
  0x10   :  { %p1141_p7 = pnand %p1140_p6, %p1134_p3 }
  0x12   :  { %1144 = shalt.err (!%p1141_p7)
}
  0x13   :  { %s1310_s18 = smov 64   ;;  %s1311_s19 = smov 4  }
  0x14   :  { %44 = dma.hbm_to_vmem [thread:$0]  %s1584_s1, 1024, %s39_s26, [#allocation6], %s1310_s18, %s1310_s18, %s1311_s19  }
  0x15   :  { %s1312_s22 = smov [#allocation8]   ;;  %s1313_s24 = smov [#allocation11]  }
  0x16   :  { %s66_s23 = sshll.u32 %s1312_s22, 4  ;;  %s94_s25 = sshll.u32 %s1313_s24, 4  ;;  %s67_s23 = int_to_ptr.vmem [resolvable:$true] %s66_s23  ;;  %s95_s25 = int_to_ptr.vmem [resolvable:$true] %s94_s25 }
  0x17   :  { %s1145_s29 = scalar_lea.hbm %s1588_s5, 1024 }
  0x18   :  { %p1146_p8 = scmp.ne.s32.totalorder %s1588_s5, %s1145_s29  ;;  %p1149_p9 = scmp.lt.u32.totalorder %s1145_s29, %s1588_s5 }
  0x1a   :  { %p1151_p10 = pnand %p1149_p9, %p1146_p8 }
  0x1c   :  { %1154 = shalt.err (!%p1151_p10)
}
  0x1d   :  { %s1155_s1 = scalar_lea.vmem %s67_s23, 1024  ;;  %p1160_p12 = scmp.lt.s32.totalorder %s67_s23, %s67_s23 }
  0x1e   :  { %p1156_p11 = scmp.ne.s32.totalorder %s67_s23, %s1155_s1  ;;  %p1161_p13 = scmp.lt.s32.totalorder %s1155_s1, %s1155_s1 }
  0x20   :  { %p1162_p0 = por %p1161_p13, %p1160_p12 }
  0x22   :  { %p1163_p1 = pnand %p1162_p0, %p1156_p11 }
  0x24   :  { %1166 = shalt.err (!%p1163_p1)
}
  0x25   :  { %72 = dma.hbm_to_vmem [thread:$0]  %s1588_s5, 1024, %s67_s23, [#allocation9], %s1310_s18, %s1310_s18, %s1311_s19  }
  0x26   :  { %s1167_s22 = scalar_lea.hbm %s1592_s9, 1024 }
  0x27   :  { %p1168_p2 = scmp.ne.s32.totalorder %s1592_s9, %s1167_s22  ;;  %p1171_p3 = scmp.lt.u32.totalorder %s1167_s22, %s1592_s9 }
  0x29   :  { %p1173_p4 = pnand %p1171_p3, %p1168_p2 }
  0x2b   :  { %1176 = shalt.err (!%p1173_p4)
}
  0x2c   :  { %s1177_s30 = scalar_lea.vmem %s95_s25, 1024  ;;  %p1182_p6 = scmp.lt.s32.totalorder %s95_s25, %s95_s25 }
  0x2d   :  { %p1178_p5 = scmp.ne.s32.totalorder %s95_s25, %s1177_s30  ;;  %p1183_p7 = scmp.lt.s32.totalorder %s1177_s30, %s1177_s30 }
  0x2f   :  { %p1184_p8 = por %p1183_p7, %p1182_p6 }
  0x31   :  { %p1185_p9 = pnand %p1184_p8, %p1178_p5 }
  0x33   :  { %1188 = shalt.err (!%p1185_p9)
}
  0x34   :  { %100 = dma.hbm_to_vmem [thread:$0]  %s1592_s9, 1024, %s95_s25, [#allocation12], %s1310_s18, %s1310_s18, %s1311_s19  }
  0x35   :  { %s1314_s14 = smov [#allocation2]   ;;  %s1315_s16 = smov [#allocation7]  }
  0x36   :  { %s29_s15 = sshll.u32 %s1314_s14, 4  ;;  %s52_s1 = sshll.u32 %s1315_s16, 4  ;;  %s30_s15 = int_to_ptr.vmem [resolvable:$true] %s29_s15  ;;  %s53_s1 = int_to_ptr.vmem [resolvable:$true] %s52_s1 }
  0x37   :  { %s1189_s20 = scalar_lea.hbm %s1583_s0, 64 }
  0x38   :  { %p1190_p10 = scmp.ne.s32.totalorder %s1583_s0, %s1189_s20  ;;  %p1193_p11 = scmp.lt.u32.totalorder %s1189_s20, %s1583_s0 }
  0x3a   :  { %p1195_p12 = pnand %p1193_p11, %p1190_p10 }
  0x3c   :  { %1198 = shalt.err (!%p1195_p12)
}
  0x3d   :  { %s1199_s9 = scalar_lea.vmem %s30_s15, 64  ;;  %p1204_p0 = scmp.lt.s32.totalorder %s30_s15, %s30_s15 }
  0x3e   :  { %p1200_p13 = scmp.ne.s32.totalorder %s30_s15, %s1199_s9  ;;  %p1205_p1 = scmp.lt.s32.totalorder %s1199_s9, %s1199_s9 }
  0x40   :  { %p1206_p2 = por %p1205_p1, %p1204_p0 }
  0x42   :  { %p1207_p3 = pnand %p1206_p2, %p1200_p13 }
  0x44   :  { %1210 = shalt.err (!%p1207_p3)
}
  0x45   :  { %32 = dma.hbm_to_vmem [thread:$0]  %s1583_s0, 64, %s30_s15, [#allocation3]  }
  0x46   :  { %s1211_s5 = scalar_lea.hbm %s1586_s3, 1024 }
  0x47   :  { %p1212_p4 = scmp.ne.s32.totalorder %s1586_s3, %s1211_s5  ;;  %p1215_p5 = scmp.lt.u32.totalorder %s1211_s5, %s1586_s3 }
  0x49   :  { %p1217_p6 = pnand %p1215_p5, %p1212_p4 }
  0x4b   :  { %1220 = shalt.err (!%p1217_p6)
}
  0x4c   :  { %s1221_s17 = scalar_lea.vmem %s53_s1, 1024  ;;  %p1226_p8 = scmp.lt.s32.totalorder %s53_s1, %s53_s1 }
  0x4d   :  { %p1222_p7 = scmp.ne.s32.totalorder %s53_s1, %s1221_s17  ;;  %p1227_p9 = scmp.lt.s32.totalorder %s1221_s17, %s1221_s17 }
  0x4f   :  { %p1228_p10 = por %p1227_p9, %p1226_p8 }
  0x51   :  { %p1229_p11 = pnand %p1228_p10, %p1222_p7 }
  0x53   :  { %1232 = shalt.err (!%p1229_p11)
}
  0x54   :  { %58 = dma.hbm_to_vmem [thread:$0]  %s1586_s3, 1024, %s53_s1, [#allocation6], %s1310_s18, %s1310_s18, %s1311_s19  }
  0x55   :  { %s1316_s20 = smov [#allocation10]   ;;  %s1317_s22 = smov [#allocation13]  }
  0x56   :  { %s80_s21 = sshll.u32 %s1316_s20, 4  ;;  %s108_s24 = sshll.u32 %s1317_s22, 4  ;;  %s81_s21 = int_to_ptr.vmem [resolvable:$true] %s80_s21  ;;  %s109_s24 = int_to_ptr.vmem [resolvable:$true] %s108_s24 }
  0x57   :  { %s1233_s25 = scalar_lea.hbm %s1590_s7, 1024 }
  0x58   :  { %p1234_p12 = scmp.ne.s32.totalorder %s1590_s7, %s1233_s25  ;;  %p1237_p13 = scmp.lt.u32.totalorder %s1233_s25, %s1590_s7 }
  0x5a   :  { %p1239_p0 = pnand %p1237_p13, %p1234_p12 }
  0x5c   :  { %1242 = shalt.err (!%p1239_p0)
}
  0x5d   :  { %s1243_s3 = scalar_lea.vmem %s81_s21, 1024  ;;  %p1248_p2 = scmp.lt.s32.totalorder %s81_s21, %s81_s21 }
  0x5e   :  { %p1244_p1 = scmp.ne.s32.totalorder %s81_s21, %s1243_s3  ;;  %p1249_p3 = scmp.lt.s32.totalorder %s1243_s3, %s1243_s3 }
  0x60   :  { %p1250_p4 = por %p1249_p3, %p1248_p2 }
  0x62   :  { %p1251_p5 = pnand %p1250_p4, %p1244_p1 }
  0x64   :  { %1254 = shalt.err (!%p1251_p5)
}
  0x65   :  { %86 = dma.hbm_to_vmem [thread:$0]  %s1590_s7, 1024, %s81_s21, [#allocation9], %s1310_s18, %s1310_s18, %s1311_s19  }
  0x66   :  { %s1255_s26 = scalar_lea.hbm %s1594_s11, 1024 }
  0x67   :  { %p1256_p6 = scmp.ne.s32.totalorder %s1594_s11, %s1255_s26  ;;  %p1259_p7 = scmp.lt.u32.totalorder %s1255_s26, %s1594_s11 }
  0x69   :  { %p1261_p8 = pnand %p1259_p7, %p1256_p6 }
  0x6b   :  { %1264 = shalt.err (!%p1261_p8)
}
  0x6c   :  { %s1265_s22 = scalar_lea.vmem %s109_s24, 1024  ;;  %p1270_p10 = scmp.lt.s32.totalorder %s109_s24, %s109_s24 }
  0x6d   :  { %p1266_p9 = scmp.ne.s32.totalorder %s109_s24, %s1265_s22  ;;  %p1271_p11 = scmp.lt.s32.totalorder %s1265_s22, %s1265_s22 }
  0x6f   :  { %p1272_p12 = por %p1271_p11, %p1270_p10 }
  0x71   :  { %p1273_p13 = pnand %p1272_p12, %p1266_p9 }
  0x73   :  { %1276 = shalt.err (!%p1273_p13)
}
  0x74   :  { %114 = dma.hbm_to_vmem [thread:$0]  %s1594_s11, 1024, %s109_s24, [#allocation12], %s1310_s18, %s1310_s18, %s1311_s19  }
  0x75   :  { %1299 = dma.done.wait [#allocation3], 64  }
  0x76   :  { %1300 = vsyncadd [#allocation3], 4294967232 }
  0x77   :  { %1301 = dma.done.wait [#allocation6], 2048  }
  0x78   :  { %1302 = vsyncadd [#allocation6], 4294965248 }
  0x79   :  { %1303 = dma.done.wait [#allocation9], 2048  }
  0x7a   :  { %1304 = vsyncadd [#allocation9], 4294965248 }
  0x7b   :  { %1305 = dma.done.wait [#allocation12], 2048  }
  0x7c   :  { %1306 = vsyncadd [#allocation12], 4294965248  ;;  %v1318_v0 = vmov 0.0   ;;  %vm1319_vm0 = vmmov 0   ;;  %v1075_v1 = vld [vmem:[#allocation5] sm:$0xff]   ;;  %v1076_v2 = vld [vmem:[#allocation5 + $0x8] sm:$0xff]  }
  0x7d   :  { %943 = vmatprep.subr.bf16.mxu0 %v1318_v0  ;;  %959 = vmatprep.mubr.msk.bf16.mxu0 %vm1319_vm0, %v1318_v0  ;;  %v1077_v3 = vld [vmem:[#allocation5 + $0x10] sm:$0xff]   ;;  %v1083_v4 = vld [vmem:[#allocation7] sm:$0xff]   ;;  %v1078_v5 = vld [vmem:[#allocation5 + $0x18] sm:$0xff]   ;;  %s1320_s29 = smov [#allocation14]  }
  0x7e   :  { %963 = vmatprep.subr.bf16.mxu1 %v1318_v0  ;;  %979 = vmatprep.mubr.msk.bf16.mxu1 %vm1319_vm0, %v1318_v0  ;;  %v1084_v6 = vld [vmem:[#allocation7 + $0x8] sm:$0xff]   ;;  %v1079_v7 = vld [vmem:[#allocation5 + $0x20] sm:$0xff]   ;;  %v1085_v8 = vld [vmem:[#allocation7 + $0x10] sm:$0xff]   ;;  %s823_s30 = sshll.u32 %s1320_s29, 4  ;;  %s824_s30 = int_to_ptr.vmem [resolvable:$true] %s823_s30 }
  0x7f   :  { %944 = vmatpush3.bf16.msra.mxu0 %v1075_v1  ;;  %964 = vmatpush3.bf16.msra.mxu1 %v1083_v4  ;;  %v1080_v9 = vld [vmem:[#allocation5 + $0x28] sm:$0xff]   ;;  %v1086_v10 = vld [vmem:[#allocation7 + $0x18] sm:$0xff]   ;;  %v1081_v11 = vld [vmem:[#allocation5 + $0x30] sm:$0xff]   ;;  %p1282_p1 = scmp.lt.s32.totalorder %s824_s30, %s824_s30 }
  0x80   :  { %945 = vmatprep.subr.bf16.mxu0 %v1318_v0  ;;  %965 = vmatprep.subr.bf16.mxu1 %v1318_v0  ;;  %v1087_v12 = vld [vmem:[#allocation7 + $0x20] sm:$0xff]   ;;  %v1082_v13 = vld [vmem:[#allocation5 + $0x38] sm:$0xff]   ;;  %v1088_v14 = vld [vmem:[#allocation7 + $0x28] sm:$0xff]  }
  0x81   :  { %v139_v15 = vld [vmem:[#allocation2] sm:$0xf]  ;;  %v1089_v16 = vld [vmem:[#allocation7 + $0x30] sm:$0xff]   ;;  %v1091_v18 = vld [vmem:[#allocation8] sm:$0xff]  }
  0x82   :  { %v1090_v17 = vld [vmem:[#allocation7 + $0x38] sm:$0xff]   ;;  %v1092_v19 = vld [vmem:[#allocation8 + $0x8] sm:$0xff]   ;;  %v1093_v20 = vld [vmem:[#allocation8 + $0x10] sm:$0xff]  }
  0x83   :  { %946 = vmatpush3.bf16.msra.mxu0 %v1076_v2  ;;  %966 = vmatpush3.bf16.msra.mxu1 %v1084_v6  ;;  %v1094_v21 = vld [vmem:[#allocation8 + $0x18] sm:$0xff]   ;;  %v1095_v22 = vld [vmem:[#allocation8 + $0x20] sm:$0xff]   ;;  %v1096_v23 = vld [vmem:[#allocation8 + $0x28] sm:$0xff]  }
  0x84   :  { %947 = vmatprep.subr.bf16.mxu0 %v1318_v0  ;;  %967 = vmatprep.subr.bf16.mxu1 %v1318_v0  ;;  %v835_v24 = vld [vmem:[%s1585_s2] ss:$0 sm:$0xff]  ;;  %v1097_v32 = vld [vmem:[#allocation8 + $0x30] sm:$0xff]   ;;  %v1099_v34 = vld [vmem:[#allocation10] sm:$0xff]  }
  0x85   :  { %v1098_v33 = vld [vmem:[#allocation8 + $0x38] sm:$0xff]   ;;  %v1100_v35 = vld [vmem:[#allocation10 + $0x8] sm:$0xff]   ;;  %v1101_v36 = vld [vmem:[#allocation10 + $0x10] sm:$0xff]  }
  0x86   :  { %v1102_v37 = vld [vmem:[#allocation10 + $0x18] sm:$0xff]   ;;  %v1103_v38 = vld [vmem:[#allocation10 + $0x20] sm:$0xff]   ;;  %v1104_v39 = vld [vmem:[#allocation10 + $0x28] sm:$0xff]  }
  0x87   :  { %948 = vmatpush3.bf16.msra.mxu0 %v1077_v3  ;;  %968 = vmatpush3.bf16.msra.mxu1 %v1085_v8  ;;  %v844_v40 = vld [vmem:[%s1587_s4] ss:$0 sm:$0xff]  ;;  %v1105_v48 = vld [vmem:[#allocation10 + $0x30] sm:$0xff]   ;;  %v1107_v50 = vld [vmem:[#allocation11] sm:$0xff]  }
  0x88   :  { %949 = vmatprep.subr.bf16.mxu0 %v1318_v0  ;;  %969 = vmatprep.subr.bf16.mxu1 %v1318_v0  ;;  %v1106_v49 = vld [vmem:[#allocation10 + $0x38] sm:$0xff]   ;;  %v1108_v51 = vld [vmem:[#allocation11 + $0x8] sm:$0xff]   ;;  %v1109_v52 = vld [vmem:[#allocation11 + $0x10] sm:$0xff]  }
  0x89   :  { %v1110_v53 = vld [vmem:[#allocation11 + $0x18] sm:$0xff]   ;;  %v1111_v54 = vld [vmem:[#allocation11 + $0x20] sm:$0xff]   ;;  %v1112_v55 = vld [vmem:[#allocation11 + $0x28] sm:$0xff]  }
  0x8a   :  { %v853_v56 = vld [vmem:[%s1589_s6] ss:$0 sm:$0xff]  ;;  %v1113_v1 = vld [vmem:[#allocation11 + $0x30] sm:$0xff]   ;;  %v1115_v3 = vld [vmem:[#allocation13] sm:$0xff]  }
  0x8b   :  { %950 = vmatpush3.bf16.msra.mxu0 %v1078_v5  ;;  %970 = vmatpush3.bf16.msra.mxu1 %v1086_v10  ;;  %v1114_v2 = vld [vmem:[#allocation11 + $0x38] sm:$0xff]   ;;  %v1116_v4 = vld [vmem:[#allocation13 + $0x8] sm:$0xff]   ;;  %v1117_v5 = vld [vmem:[#allocation13 + $0x10] sm:$0xff]  }
  0x8c   :  { %951 = vmatprep.subr.bf16.mxu0 %v1318_v0  ;;  %971 = vmatprep.subr.bf16.mxu1 %v1318_v0  ;;  %v1118_v6 = vld [vmem:[#allocation13 + $0x18] sm:$0xff]   ;;  %v1120_v8 = vld [vmem:[#allocation13 + $0x28] sm:$0xff]  }
  0x8f   :  { %952 = vmatpush3.bf16.msra.mxu0 %v1079_v7  ;;  %972 = vmatpush3.bf16.msra.mxu1 %v1087_v12  ;;  %v1119_v7 = vld [vmem:[#allocation13 + $0x20] sm:$0xff]  }
  0x90   :  { %953 = vmatprep.subr.bf16.mxu0 %v1318_v0  ;;  %973 = vmatprep.subr.bf16.mxu1 %v1318_v0 }
  0x93   :  { %954 = vmatpush3.bf16.msra.mxu0 %v1080_v9  ;;  %974 = vmatpush3.bf16.msra.mxu1 %v1088_v14  ;;  %v862_v9 = vld [vmem:[%s1591_s8] ss:$0 sm:$0xff] }
  0x94   :  { %955 = vmatprep.subr.bf16.mxu0 %v1318_v0  ;;  %975 = vmatprep.subr.bf16.mxu1 %v1318_v0 }
  0x97   :  { %956 = vmatpush3.bf16.msra.mxu0 %v1081_v11  ;;  %976 = vmatpush3.bf16.msra.mxu1 %v1089_v16 }
  0x98   :  { %957 = vmatprep.subr.bf16.mxu0 %v1318_v0  ;;  %977 = vmatprep.subr.bf16.mxu1 %v1318_v0 }
  0x9b   :  { %958 = vmatpush3.bf16.msra.mxu0 %v1082_v13  ;;  %978 = vmatpush3.bf16.msra.mxu1 %v1090_v17  ;;  %v1121_v17 = vld [vmem:[#allocation13 + $0x30] sm:$0xff]  }
  0x9c   :  { %983 = vmatprep.subr.bf16.mxu0 %v1318_v0  ;;  %1003 = vmatprep.subr.bf16.mxu1 %v1318_v0 }
  0x9e   :  { %960 = vmatmul.mubr.bf16.vlgmr.msra.gmra.mrb[0].mxu0 %v139_v15 }
  0x9f   :  { %999 = vmatprep.mubr.msk.bf16.mxu0 %vm1319_vm0, %v1318_v0  ;;  %984 = vmatpush3.bf16.msra.mxu0 %v1091_v18  ;;  %v1122_v18 = vld [vmem:[#allocation13 + $0x38] sm:$0xff]  }
  0xa0   :  { %985 = vmatprep.subr.bf16.mxu0 %v1318_v0 }
  0xa3   :  { %986 = vmatpush3.bf16.msra.mxu0 %v1092_v19  ;;  %v871_v19 = vld [vmem:[%s1593_s10] ss:$0 sm:$0xff]  ;;  %s1277_s10 = scalar_lea.vmem %s824_s30, 128 }
  0xa4   :  { %987 = vmatprep.subr.bf16.mxu0 %v1318_v0  ;;  %p1278_p0 = scmp.ne.s32.totalorder %s824_s30, %s1277_s10  ;;  %p1283_p2 = scmp.lt.s32.totalorder %s1277_s10, %s1277_s10 }
  0xa6   :  { %p1284_p3 = por %p1283_p2, %p1282_p1 }
  0xa7   :  { %988 = vmatpush3.bf16.msra.mxu0 %v1093_v20 }
  0xa8   :  { %989 = vmatprep.subr.bf16.mxu0 %v1318_v0  ;;  %p1285_p4 = pnand %p1284_p3, %p1278_p0 }
  0xab   :  { %990 = vmatpush3.bf16.msra.mxu0 %v1094_v21 }
  0xac   :  { %991 = vmatprep.subr.bf16.mxu0 %v1318_v0 }
  0xaf   :  { %992 = vmatpush3.bf16.msra.mxu0 %v1095_v22 }
  0xb0   :  { %993 = vmatprep.subr.bf16.mxu0 %v1318_v0 }
  0xb3   :  { %994 = vmatpush3.bf16.msra.mxu0 %v1096_v23 }
  0xb4   :  { %995 = vmatprep.subr.bf16.mxu0 %v1318_v0 }
  0xb7   :  { %996 = vmatpush3.bf16.msra.mxu0 %v1097_v32 }
  0xb8   :  { %997 = vmatprep.subr.bf16.mxu0 %v1318_v0 }
  0xbb   :  { %998 = vmatpush3.bf16.msra.mxu0 %v1098_v33 }
  0xbc   :  { %1023 = vmatprep.subr.bf16.mxu0 %v1318_v0 }
 0x171   :  { %v245_v25 = vpop.f32.mrb[0].mxu0 }
 0x172   :  { %v246_v26 = vadd.f32 %v835_v24, %v245_v25  ;;  %v961_v27 = vpop.f32.mrb[1].mxu0 }
 0x173   :  { %v248_v28 = vpop.f32.mrb[2].mxu0  ;;  %v880_v27 = vld [vmem:[%s1595_s12] ss:$0 sm:$0xff] }
 0x174   :  { %v251_v29 = vmax.f32 %v246_v26, 0.0  ;;  %v962_v30 = vpop.f32.mrb[3].mxu0 }
 0x176   :  { %v252_v31 = vpack.c.bf16 %v251_v29, %v251_v29 }
 0x178   :  { %980 = vmatmul.mubr.bf16.vlgmr.msra.gmra.mrb[0].mxu1 %v252_v31 }
 0x179   :  { %1019 = vmatprep.mubr.msk.bf16.mxu1 %vm1319_vm0, %v1318_v0  ;;  %1004 = vmatpush3.bf16.msra.mxu1 %v1099_v34 }
 0x17a   :  { %1005 = vmatprep.subr.bf16.mxu1 %v1318_v0 }
 0x17d   :  { %1006 = vmatpush3.bf16.msra.mxu1 %v1100_v35 }
 0x17e   :  { %1007 = vmatprep.subr.bf16.mxu1 %v1318_v0 }
 0x181   :  { %1008 = vmatpush3.bf16.msra.mxu1 %v1101_v36 }
 0x182   :  { %1009 = vmatprep.subr.bf16.mxu1 %v1318_v0 }
 0x185   :  { %1010 = vmatpush3.bf16.msra.mxu1 %v1102_v37 }
 0x186   :  { %1011 = vmatprep.subr.bf16.mxu1 %v1318_v0 }
 0x189   :  { %1012 = vmatpush3.bf16.msra.mxu1 %v1103_v38 }
 0x18a   :  { %1013 = vmatprep.subr.bf16.mxu1 %v1318_v0 }
 0x18d   :  { %1014 = vmatpush3.bf16.msra.mxu1 %v1104_v39 }
 0x18e   :  { %1015 = vmatprep.subr.bf16.mxu1 %v1318_v0 }
 0x191   :  { %1016 = vmatpush3.bf16.msra.mxu1 %v1105_v48 }
 0x192   :  { %1017 = vmatprep.subr.bf16.mxu1 %v1318_v0 }
 0x195   :  { %1018 = vmatpush3.bf16.msra.mxu1 %v1106_v49 }
 0x196   :  { %1043 = vmatprep.subr.bf16.mxu1 %v1318_v0 }
 0x24b   :  { %v358_v41 = vpop.f32.mrb[0].mxu1 }
 0x24c   :  { %v359_v42 = vadd.f32 %v844_v40, %v358_v41  ;;  %v981_v43 = vpop.f32.mrb[1].mxu1 }
 0x24d   :  { %v361_v44 = vpop.f32.mrb[2].mxu1 }
 0x24e   :  { %v364_v45 = vmax.f32 %v359_v42, 0.0  ;;  %v982_v46 = vpop.f32.mrb[3].mxu1 }
 0x250   :  { %v365_v47 = vpack.c.bf16 %v364_v45, %v364_v45 }
 0x252   :  { %1000 = vmatmul.mubr.bf16.vlgmr.msra.gmra.mrb[4].mxu0 %v365_v47 }
 0x253   :  { %1039 = vmatprep.mubr.msk.bf16.mxu0 %vm1319_vm0, %v1318_v0  ;;  %1024 = vmatpush3.bf16.msra.mxu0 %v1107_v50 }
 0x254   :  { %1025 = vmatprep.subr.bf16.mxu0 %v1318_v0 }
 0x257   :  { %1026 = vmatpush3.bf16.msra.mxu0 %v1108_v51 }
 0x258   :  { %1027 = vmatprep.subr.bf16.mxu0 %v1318_v0 }
 0x25b   :  { %1028 = vmatpush3.bf16.msra.mxu0 %v1109_v52 }
 0x25c   :  { %1029 = vmatprep.subr.bf16.mxu0 %v1318_v0 }
 0x25f   :  { %1030 = vmatpush3.bf16.msra.mxu0 %v1110_v53 }
 0x260   :  { %1031 = vmatprep.subr.bf16.mxu0 %v1318_v0 }
 0x263   :  { %1032 = vmatpush3.bf16.msra.mxu0 %v1111_v54 }
 0x264   :  { %1033 = vmatprep.subr.bf16.mxu0 %v1318_v0 }
 0x267   :  { %1034 = vmatpush3.bf16.msra.mxu0 %v1112_v55 }
 0x268   :  { %1035 = vmatprep.subr.bf16.mxu0 %v1318_v0 }
 0x26b   :  { %1036 = vmatpush3.bf16.msra.mxu0 %v1113_v1 }
 0x26c   :  { %1037 = vmatprep.subr.bf16.mxu0 %v1318_v0 }
 0x26f   :  { %1038 = vmatpush3.bf16.msra.mxu0 %v1114_v2 }
 0x325   :  { %v471_v57 = vpop.f32.mrb[4].mxu0 }
 0x326   :  { %v472_v58 = vadd.f32 %v853_v56, %v471_v57  ;;  %v1001_v59 = vpop.f32.mrb[5].mxu0 }
 0x327   :  { %v474_v60 = vpop.f32.mrb[6].mxu0 }
 0x328   :  { %v477_v61 = vmax.f32 %v472_v58, 0.0  ;;  %v1002_v62 = vpop.f32.mrb[7].mxu0 }
 0x32a   :  { %v478_v63 = vpack.c.bf16 %v477_v61, %v477_v61 }
 0x32c   :  { %1020 = vmatmul.mubr.bf16.vlgmr.msra.gmra.mrb[4].mxu1 %v478_v63 }
 0x32d   :  { %1059 = vmatprep.mubr.msk.bf16.mxu1 %vm1319_vm0, %v1318_v0  ;;  %1044 = vmatpush3.bf16.msra.mxu1 %v1115_v3 }
 0x32e   :  { %1045 = vmatprep.subr.bf16.mxu1 %v1318_v0 }
 0x331   :  { %1046 = vmatpush3.bf16.msra.mxu1 %v1116_v4 }
 0x332   :  { %1047 = vmatprep.subr.bf16.mxu1 %v1318_v0 }
 0x335   :  { %1048 = vmatpush3.bf16.msra.mxu1 %v1117_v5 }
 0x336   :  { %1049 = vmatprep.subr.bf16.mxu1 %v1318_v0 }
 0x339   :  { %1050 = vmatpush3.bf16.msra.mxu1 %v1118_v6 }
 0x33a   :  { %1051 = vmatprep.subr.bf16.mxu1 %v1318_v0 }
 0x33d   :  { %1052 = vmatpush3.bf16.msra.mxu1 %v1119_v7 }
 0x33e   :  { %1053 = vmatprep.subr.bf16.mxu1 %v1318_v0 }
 0x341   :  { %1054 = vmatpush3.bf16.msra.mxu1 %v1120_v8 }
 0x342   :  { %1055 = vmatprep.subr.bf16.mxu1 %v1318_v0 }
 0x345   :  { %1056 = vmatpush3.bf16.msra.mxu1 %v1121_v17 }
 0x346   :  { %1057 = vmatprep.subr.bf16.mxu1 %v1318_v0 }
 0x349   :  { %1058 = vmatpush3.bf16.msra.mxu1 %v1122_v18 }
 0x3ff   :  { %v584_v10 = vpop.f32.mrb[4].mxu1 }
 0x400   :  { %v585_v11 = vadd.f32 %v862_v9, %v584_v10  ;;  %v1021_v12 = vpop.f32.mrb[5].mxu1 }
 0x401   :  { %v587_v13 = vpop.f32.mrb[6].mxu1 }
 0x402   :  { %v590_v14 = vmax.f32 %v585_v11, 0.0  ;;  %v1022_v15 = vpop.f32.mrb[7].mxu1 }
 0x404   :  { %v591_v16 = vpack.c.bf16 %v590_v14, %v590_v14 }
 0x406   :  { %1040 = vmatmul.mubr.bf16.vlgmr.msra.gmra.mrb[8].mxu0 %v591_v16 }
 0x4d9   :  { %v697_v20 = vpop.f32.mrb[8].mxu0 }
 0x4da   :  { %v698_v21 = vadd.f32 %v871_v19, %v697_v20  ;;  %v1041_v22 = vpop.f32.mrb[9].mxu0 }
 0x4db   :  { %v700_v23 = vpop.f32.mrb[10].mxu0 }
 0x4dc   :  { %v703_v24 = vmax.f32 %v698_v21, 0.0  ;;  %v1042_v25 = vpop.f32.mrb[11].mxu0 }
 0x4de   :  { %v704_v26 = vpack.c.bf16 %v703_v24, %v703_v24 }
 0x4e0   :  { %1060 = vmatmul.mubr.bf16.vlgmr.msra.gmra.mrb[8].mxu1 %v704_v26 }
 0x5b3   :  { %v810_v0 = vpop.f32.mrb[8].mxu1 }
 0x5b4   :  { %v811_v28 = vadd.f32 %v880_v27, %v810_v0  ;;  %v1061_v29 = vpop.f32.mrb[9].mxu1 }
 0x5b5   :  { %v813_v30 = vpop.f32.mrb[10].mxu1 }
 0x5b6   :  { %816 = vst [vmem:[#allocation14] sm:$0xff] %v811_v28  ;;  %v1062_v31 = vpop.f32.mrb[11].mxu1 }
 0x5b7   :  { %1288 = shalt.err (!%p1285_p4)
}
 0x5b8   :  { %s1289_s12 = scalar_lea.hbm %s1596_s13, 128 }
 0x5b9   :  { %p1290_p5 = scmp.ne.s32.totalorder %s1596_s13, %s1289_s12  ;;  %p1293_p6 = scmp.lt.u32.totalorder %s1289_s12, %s1596_s13 }
 0x5bb   :  { %p1295_p7 = pnand %p1293_p6, %p1290_p5 }
 0x5bd   :  { %1298 = shalt.err (!%p1295_p7)
}
 0x5be   :  { %826 = dma.vmem_to_hbm [thread:$0]  %s824_s30, 128, %s1596_s13, [#allocation4]  }
 0x5bf   :  { %1307 = dma.done.wait [#allocation4], 128  }
 0x5c0   :  { %1308 = vsyncadd [#allocation4], 4294967168 }
 0x5c1   :  { %830 = vsyncpa [#allocation3], 1 }
 0x5c2   :  { %831 = vsyncpa [#allocation6], 1 }
 0x5c3   :  { %832 = vsyncpa [#allocation9], 1 }
 0x5c4   :  { %833 = vsyncpa [#allocation12], 1 }
 0x5c5   :  { %834 = vsyncpa [#allocation4], 1 }

</bundles_post_ra>
